<compile_context>
chip_gen: v7x
topology: tpu7x:2x2x1
jax: 0.10.0
libtpu: 0.0.40
codegen_flags: <defaults>
</compile_context>

<pallas_src>
import jax
import jax.numpy as jnp
from jax.experimental import pallas as pl
from jax.experimental.pallas import tpu as pltpu

SEQ_LEN = 5
BATCH = 1
INPUT_SIZE = 4
HIDDEN_SIZE = 4
NUM_LAYERS = 1  # only 1 supported (matches module default)


def gru_kernel(x_ref, w_cat_ref, out_ref):
    """Whole GRU forward in one invocation (batch == 1).

    x_ref:     (S*B, I)      all timestep inputs (row-major over (t, b))
    w_cat_ref: (I+H, 3H)     [W_ih^T ; W_hh^T], gates ordered [r | z | n]
    out_ref:   (S*B, H)      hidden state for every timestep
    """
    S, B, I, H = SEQ_LEN, BATCH, INPUT_SIZE, HIDDEN_SIZE

    x = x_ref[...]                                   # (S*B, I)
    w_ih_t = w_cat_ref[0:I, :]                       # (I, 3H)
    w_hh_t = w_cat_ref[I:I + H, :]                   # (H, 3H)

    # Small identity used for the row->column relayout of h each step
    # (mask-multiply + lane reduce; avoids a sub-tile transpose op).
    row_ids = jax.lax.broadcasted_iota(jnp.int32, (H, H), 0)
    col_ids = jax.lax.broadcasted_iota(jnp.int32, (H, H), 1)
    eye_h = (row_ids == col_ids).astype(jnp.float32)             # (H, H)

    # Input projection for ALL timesteps as I broadcast-FMAs (VPU only,
    # off the serial chain) -- no MXU push for a (5,4)x(4,12) matmul.
    gi_all = x[:, 0:1] * w_ih_t[0:1, :]                          # (S*B, 3H)
    for k in range(1, I):
        gi_all = gi_all + x[:, k:k + 1] * w_ih_t[k:k + 1, :]

    # Hidden state carried in row layout (1, H) for the element-wise update
    # and in column layout (H, 1) for the recurrent matvec.
    h_row = jnp.zeros((B, H), dtype=jnp.float32)
    h_col = jnp.zeros((H, B), dtype=jnp.float32)

    for t in range(S):  # static unroll, S == 5
        gi = gi_all[t * B:(t + 1) * B, :]                        # (1, 3H)

        # gh = h @ W_hh^T as ONE broadcast multiply + ONE sublane reduction.
        gh = jnp.sum(h_col * w_hh_t, axis=0, keepdims=True)      # (1, 3H)

        # Fused r/z sigmoid over the contiguous first 2H lanes (one EUP push).
        rz = jax.nn.sigmoid(gi[:, 0:2 * H] + gh[:, 0:2 * H])     # (1, 2H)
        r = rz[:, 0:H]
        z = rz[:, H:2 * H]
        n = jnp.tanh(gi[:, 2 * H:3 * H] + r * gh[:, 2 * H:3 * H])  # (1, H)

        h_row = (1.0 - z) * n + z * h_row                        # (1, H)

        # Per-step store into the resident VMEM output block (no concat chain).
        out_ref[t * B:(t + 1) * B, :] = h_row.astype(out_ref.dtype)

        # Refresh the column-layout copy for the next step's matvec.
        if t + 1 < S:
            h_col = jnp.sum(eye_h * h_row, axis=1, keepdims=True)  # (H, 1)


def prepare_weights(w_ih, w_hh):
    """One-time weight prep (hoisted out of the per-call hot path).

    w_ih: (3H, I); w_hh: (3H, H) in PyTorch layout -> (I+H, 3H) VMEM block.
    """
    return jnp.concatenate(
        [jnp.transpose(w_ih), jnp.transpose(w_hh)], axis=0
    ).astype(jnp.float32)


@jax.jit
def gru_forward(inputs, w_cat):
    """inputs: (S, B, I); w_cat: (I+H, 3H) from prepare_weights()."""
    S, B, I = inputs.shape
    assert B == 1, "kernel assumes batch_size == 1 (as in the module spec)"
    H = HIDDEN_SIZE
    x2d = inputs.reshape(S * B, I).astype(jnp.float32)

    out = pl.pallas_call(
        gru_kernel,
        out_shape=jax.ShapeDtypeStruct((S * B, H), jnp.float32),
        in_specs=[
            pl.BlockSpec(memory_space=pltpu.MemorySpace.VMEM),  # whole x
            pl.BlockSpec(memory_space=pltpu.MemorySpace.VMEM),  # whole weights
        ],
        out_specs=pl.BlockSpec(memory_space=pltpu.MemorySpace.VMEM),
    )(x2d, w_cat)

    # matches `out.view(-1, hidden_size)`
    return out


def make_inputs():
    one_hot_lookup = jnp.eye(4, dtype=jnp.float32)
    x_data = jnp.array([1, 0, 2, 2, 3], dtype=jnp.int32)
    x_one_hot = one_hot_lookup[x_data]                      # (5, 4)
    return x_one_hot.reshape(SEQ_LEN, BATCH, INPUT_SIZE)    # (5, 1, 4)


def make_params(key):
    # PyTorch GRU init: U(-1/sqrt(H), 1/sqrt(H)); bias=False so only weights.
    k1, k2 = jax.random.split(key)
    bound = 1.0 / jnp.sqrt(jnp.float32(HIDDEN_SIZE))
    w_ih = jax.random.uniform(k1, (3 * HIDDEN_SIZE, INPUT_SIZE),
                              minval=-bound, maxval=bound, dtype=jnp.float32)
    w_hh = jax.random.uniform(k2, (3 * HIDDEN_SIZE, HIDDEN_SIZE),
                              minval=-bound, maxval=bound, dtype=jnp.float32)
    return w_ih, w_hh


def gru_reference(inputs, w_ih, w_hh):
    """Pure-JAX reference (matches torch.nn.GRU, bias=False)."""
    H = HIDDEN_SIZE
    hp = jax.lax.Precision.HIGHEST
    h = jnp.zeros((inputs.shape[1], H), dtype=jnp.float32)
    outs = []
    for t in range(inputs.shape[0]):
        x = inputs[t]
        gi = jnp.dot(x, w_ih.T, precision=hp)
        gh = jnp.dot(h, w_hh.T, precision=hp)
        r = jax.nn.sigmoid(gi[:, :H] + gh[:, :H])
        z = jax.nn.sigmoid(gi[:, H:2 * H] + gh[:, H:2 * H])
        n = jnp.tanh(gi[:, 2 * H:] + r * gh[:, 2 * H:])
        h = (1.0 - z) * n + z * h
        outs.append(h)
    return jnp.stack(outs).reshape(-1, H)


if __name__ == "__main__":
    key = jax.random.PRNGKey(0)
    inputs = make_inputs()
    w_ih, w_hh = make_params(key)

    # Weight prep happens once, outside the per-call path.
    w_cat = jax.block_until_ready(prepare_weights(w_ih, w_hh))

    out = gru_forward(inputs, w_cat)
    out = jax.block_until_ready(out)

    ref = gru_reference(inputs, w_ih, w_hh)
    assert out.shape == (SEQ_LEN * BATCH, HIDDEN_SIZE)
    assert jnp.allclose(out, ref, atol=1e-5, rtol=1e-5)

    print("KERNEL_OK")
</pallas_src>

<mosaic_0001>
module attributes {stable_mosaic.version = 11 : i64} {
  func.func @gru_kernel(%arg0: memref<5x4xf32, #tpu.memory_space<vmem>>, %arg1: memref<8x12xf32, #tpu.memory_space<vmem>>, %arg2: memref<5x4xf32, #tpu.memory_space<vmem>>) attributes {dimension_semantics = [], scalar_prefetch = 0 : i64, scratch_operands = 0 : i64, tpu.core_type = #tpu.core_type<tc>} {
    %c0 = arith.constant 0 : index
    %c0_0 = arith.constant 0 : index
    %0 = vector.load %arg0[%c0, %c0_0] : memref<5x4xf32, #tpu.memory_space<vmem>>, vector<5x4xf32>
    %c0_1 = arith.constant 0 : index
    %c0_2 = arith.constant 0 : index
    %1 = vector.load %arg1[%c0_1, %c0_2] : memref<8x12xf32, #tpu.memory_space<vmem>>, vector<4x12xf32>
    %c4 = arith.constant 4 : index
    %c0_3 = arith.constant 0 : index
    %2 = vector.load %arg1[%c4, %c0_3] : memref<8x12xf32, #tpu.memory_space<vmem>>, vector<4x12xf32>
    %3 = tpu.iota {dimensions = array<i32: 0>} : vector<4x4xi32>
    %4 = tpu.iota {dimensions = array<i32: 1>} : vector<4x4xi32>
    %5 = arith.cmpi eq, %3, %4 : vector<4x4xi32>
    %6 = arith.extui %5 : vector<4x4xi1> to vector<4x4xi32>
    %7 = arith.sitofp %6 : vector<4x4xi32> to vector<4x4xf32>
    %8 = vector.extract_strided_slice %0 {offsets = [0, 0], sizes = [5, 1], strides = [1, 1]} : vector<5x4xf32> to vector<5x1xf32>
    %9 = vector.extract_strided_slice %1 {offsets = [0, 0], sizes = [1, 12], strides = [1, 1]} : vector<4x12xf32> to vector<1x12xf32>
    %10 = vector.broadcast %8 : vector<5x1xf32> to vector<5x12xf32>
    %11 = vector.broadcast %9 : vector<1x12xf32> to vector<5x12xf32>
    %12 = arith.mulf %10, %11 : vector<5x12xf32>
    %13 = vector.extract_strided_slice %0 {offsets = [0, 1], sizes = [5, 1], strides = [1, 1]} : vector<5x4xf32> to vector<5x1xf32>
    %14 = vector.extract_strided_slice %1 {offsets = [1, 0], sizes = [1, 12], strides = [1, 1]} : vector<4x12xf32> to vector<1x12xf32>
    %15 = vector.broadcast %13 : vector<5x1xf32> to vector<5x12xf32>
    %16 = vector.broadcast %14 : vector<1x12xf32> to vector<5x12xf32>
    %17 = arith.mulf %15, %16 : vector<5x12xf32>
    %18 = arith.addf %12, %17 : vector<5x12xf32>
    %19 = vector.extract_strided_slice %0 {offsets = [0, 2], sizes = [5, 1], strides = [1, 1]} : vector<5x4xf32> to vector<5x1xf32>
    %20 = vector.extract_strided_slice %1 {offsets = [2, 0], sizes = [1, 12], strides = [1, 1]} : vector<4x12xf32> to vector<1x12xf32>
    %21 = vector.broadcast %19 : vector<5x1xf32> to vector<5x12xf32>
    %22 = vector.broadcast %20 : vector<1x12xf32> to vector<5x12xf32>
    %23 = arith.mulf %21, %22 : vector<5x12xf32>
    %24 = arith.addf %18, %23 : vector<5x12xf32>
    %25 = vector.extract_strided_slice %0 {offsets = [0, 3], sizes = [5, 1], strides = [1, 1]} : vector<5x4xf32> to vector<5x1xf32>
    %26 = vector.extract_strided_slice %1 {offsets = [3, 0], sizes = [1, 12], strides = [1, 1]} : vector<4x12xf32> to vector<1x12xf32>
    %27 = vector.broadcast %25 : vector<5x1xf32> to vector<5x12xf32>
    %28 = vector.broadcast %26 : vector<1x12xf32> to vector<5x12xf32>
    %29 = arith.mulf %27, %28 : vector<5x12xf32>
    %30 = arith.addf %24, %29 : vector<5x12xf32>
    %cst = arith.constant 0.000000e+00 : f32
    %31 = vector.broadcast %cst : f32 to vector<1x4xf32>
    %cst_4 = arith.constant 0.000000e+00 : f32
    %32 = vector.broadcast %cst_4 : f32 to vector<4x1xf32>
    %33 = vector.extract_strided_slice %30 {offsets = [0, 0], sizes = [1, 12], strides = [1, 1]} : vector<5x12xf32> to vector<1x12xf32>
    %34 = vector.broadcast %32 : vector<4x1xf32> to vector<4x12xf32>
    %35 = arith.mulf %34, %2 : vector<4x12xf32>
    %cst_5 = arith.constant dense<0.000000e+00> : vector<12xf32>
    %36 = vector.multi_reduction <add>, %35, %cst_5 [0] : vector<4x12xf32> to vector<12xf32>
    %37 = vector.shape_cast %36 : vector<12xf32> to vector<1x12xf32>
    %38 = vector.extract_strided_slice %33 {offsets = [0, 0], sizes = [1, 8], strides = [1, 1]} : vector<1x12xf32> to vector<1x8xf32>
    %39 = vector.extract_strided_slice %37 {offsets = [0, 0], sizes = [1, 8], strides = [1, 1]} : vector<1x12xf32> to vector<1x8xf32>
    %40 = arith.addf %38, %39 : vector<1x8xf32>
    %41 = arith.negf %40 : vector<1x8xf32>
    %42 = math.exp %41 : vector<1x8xf32>
    %cst_6 = arith.constant 1.000000e+00 : f32
    %43 = vector.broadcast %cst_6 : f32 to vector<1x8xf32>
    %44 = arith.addf %43, %42 : vector<1x8xf32>
    %45 = arith.divf %43, %44 : vector<1x8xf32>
    %46 = vector.extract_strided_slice %45 {offsets = [0, 0], sizes = [1, 4], strides = [1, 1]} : vector<1x8xf32> to vector<1x4xf32>
    %47 = vector.extract_strided_slice %45 {offsets = [0, 4], sizes = [1, 4], strides = [1, 1]} : vector<1x8xf32> to vector<1x4xf32>
    %48 = vector.extract_strided_slice %33 {offsets = [0, 8], sizes = [1, 4], strides = [1, 1]} : vector<1x12xf32> to vector<1x4xf32>
    %49 = vector.extract_strided_slice %37 {offsets = [0, 8], sizes = [1, 4], strides = [1, 1]} : vector<1x12xf32> to vector<1x4xf32>
    %50 = arith.mulf %46, %49 : vector<1x4xf32>
    %51 = arith.addf %48, %50 : vector<1x4xf32>
    %52 = math.tanh %51 : vector<1x4xf32>
    %cst_7 = arith.constant 1.000000e+00 : f32
    %53 = vector.broadcast %cst_7 : f32 to vector<1x4xf32>
    %54 = arith.subf %53, %47 : vector<1x4xf32>
    %55 = arith.mulf %54, %52 : vector<1x4xf32>
    %56 = arith.mulf %47, %31 : vector<1x4xf32>
    %57 = arith.addf %55, %56 : vector<1x4xf32>
    %c0_8 = arith.constant 0 : index
    %c0_9 = arith.constant 0 : index
    %58 = vector.load %arg2[%c0_8, %c0_9] : memref<5x4xf32, #tpu.memory_space<vmem>>, vector<1x4xf32>
    tpu.vector_store %arg2[%c0_8, %c0_9], %57 {strides = array<i32>} : memref<5x4xf32, #tpu.memory_space<vmem>>, vector<1x4xf32>,
    %59 = vector.broadcast %57 : vector<1x4xf32> to vector<4x4xf32>
    %60 = arith.mulf %7, %59 : vector<4x4xf32>
    %cst_10 = arith.constant dense<0.000000e+00> : vector<4xf32>
    %61 = vector.multi_reduction <add>, %60, %cst_10 [1] : vector<4x4xf32> to vector<4xf32>
    %62 = vector.shape_cast %61 : vector<4xf32> to vector<4x1xf32>
    %63 = vector.extract_strided_slice %30 {offsets = [1, 0], sizes = [1, 12], strides = [1, 1]} : vector<5x12xf32> to vector<1x12xf32>
    %64 = vector.broadcast %62 : vector<4x1xf32> to vector<4x12xf32>
    %65 = arith.mulf %64, %2 : vector<4x12xf32>
    %cst_11 = arith.constant dense<0.000000e+00> : vector<12xf32>
    %66 = vector.multi_reduction <add>, %65, %cst_11 [0] : vector<4x12xf32> to vector<12xf32>
    %67 = vector.shape_cast %66 : vector<12xf32> to vector<1x12xf32>
    %68 = vector.extract_strided_slice %63 {offsets = [0, 0], sizes = [1, 8], strides = [1, 1]} : vector<1x12xf32> to vector<1x8xf32>
    %69 = vector.extract_strided_slice %67 {offsets = [0, 0], sizes = [1, 8], strides = [1, 1]} : vector<1x12xf32> to vector<1x8xf32>
    %70 = arith.addf %68, %69 : vector<1x8xf32>
    %71 = arith.negf %70 : vector<1x8xf32>
    %72 = math.exp %71 : vector<1x8xf32>
    %cst_12 = arith.constant 1.000000e+00 : f32
    %73 = vector.broadcast %cst_12 : f32 to vector<1x8xf32>
    %74 = arith.addf %73, %72 : vector<1x8xf32>
    %75 = arith.divf %73, %74 : vector<1x8xf32>
    %76 = vector.extract_strided_slice %75 {offsets = [0, 0], sizes = [1, 4], strides = [1, 1]} : vector<1x8xf32> to vector<1x4xf32>
    %77 = vector.extract_strided_slice %75 {offsets = [0, 4], sizes = [1, 4], strides = [1, 1]} : vector<1x8xf32> to vector<1x4xf32>
    %78 = vector.extract_strided_slice %63 {offsets = [0, 8], sizes = [1, 4], strides = [1, 1]} : vector<1x12xf32> to vector<1x4xf32>
    %79 = vector.extract_strided_slice %67 {offsets = [0, 8], sizes = [1, 4], strides = [1, 1]} : vector<1x12xf32> to vector<1x4xf32>
    %80 = arith.mulf %76, %79 : vector<1x4xf32>
    %81 = arith.addf %78, %80 : vector<1x4xf32>
    %82 = math.tanh %81 : vector<1x4xf32>
    %cst_13 = arith.constant 1.000000e+00 : f32
    %83 = vector.broadcast %cst_13 : f32 to vector<1x4xf32>
    %84 = arith.subf %83, %77 : vector<1x4xf32>
    %85 = arith.mulf %84, %82 : vector<1x4xf32>
    %86 = arith.mulf %77, %57 : vector<1x4xf32>
    %87 = arith.addf %85, %86 : vector<1x4xf32>
    %c1 = arith.constant 1 : index
    %c0_14 = arith.constant 0 : index
    %88 = vector.load %arg2[%c1, %c0_14] : memref<5x4xf32, #tpu.memory_space<vmem>>, vector<1x4xf32>
    tpu.vector_store %arg2[%c1, %c0_14], %87 {strides = array<i32>} : memref<5x4xf32, #tpu.memory_space<vmem>>, vector<1x4xf32>,
    %89 = vector.broadcast %87 : vector<1x4xf32> to vector<4x4xf32>
    %90 = arith.mulf %7, %89 : vector<4x4xf32>
    %cst_15 = arith.constant dense<0.000000e+00> : vector<4xf32>
    %91 = vector.multi_reduction <add>, %90, %cst_15 [1] : vector<4x4xf32> to vector<4xf32>
    %92 = vector.shape_cast %91 : vector<4xf32> to vector<4x1xf32>
    %93 = vector.extract_strided_slice %30 {offsets = [2, 0], sizes = [1, 12], strides = [1, 1]} : vector<5x12xf32> to vector<1x12xf32>
    %94 = vector.broadcast %92 : vector<4x1xf32> to vector<4x12xf32>
    %95 = arith.mulf %94, %2 : vector<4x12xf32>
    %cst_16 = arith.constant dense<0.000000e+00> : vector<12xf32>
    %96 = vector.multi_reduction <add>, %95, %cst_16 [0] : vector<4x12xf32> to vector<12xf32>
    %97 = vector.shape_cast %96 : vector<12xf32> to vector<1x12xf32>
    %98 = vector.extract_strided_slice %93 {offsets = [0, 0], sizes = [1, 8], strides = [1, 1]} : vector<1x12xf32> to vector<1x8xf32>
    %99 = vector.extract_strided_slice %97 {offsets = [0, 0], sizes = [1, 8], strides = [1, 1]} : vector<1x12xf32> to vector<1x8xf32>
    %100 = arith.addf %98, %99 : vector<1x8xf32>
    %101 = arith.negf %100 : vector<1x8xf32>
    %102 = math.exp %101 : vector<1x8xf32>
    %cst_17 = arith.constant 1.000000e+00 : f32
    %103 = vector.broadcast %cst_17 : f32 to vector<1x8xf32>
    %104 = arith.addf %103, %102 : vector<1x8xf32>
    %105 = arith.divf %103, %104 : vector<1x8xf32>
    %106 = vector.extract_strided_slice %105 {offsets = [0, 0], sizes = [1, 4], strides = [1, 1]} : vector<1x8xf32> to vector<1x4xf32>
    %107 = vector.extract_strided_slice %105 {offsets = [0, 4], sizes = [1, 4], strides = [1, 1]} : vector<1x8xf32> to vector<1x4xf32>
    %108 = vector.extract_strided_slice %93 {offsets = [0, 8], sizes = [1, 4], strides = [1, 1]} : vector<1x12xf32> to vector<1x4xf32>
    %109 = vector.extract_strided_slice %97 {offsets = [0, 8], sizes = [1, 4], strides = [1, 1]} : vector<1x12xf32> to vector<1x4xf32>
    %110 = arith.mulf %106, %109 : vector<1x4xf32>
    %111 = arith.addf %108, %110 : vector<1x4xf32>
    %112 = math.tanh %111 : vector<1x4xf32>
    %cst_18 = arith.constant 1.000000e+00 : f32
    %113 = vector.broadcast %cst_18 : f32 to vector<1x4xf32>
    %114 = arith.subf %113, %107 : vector<1x4xf32>
    %115 = arith.mulf %114, %112 : vector<1x4xf32>
    %116 = arith.mulf %107, %87 : vector<1x4xf32>
    %117 = arith.addf %115, %116 : vector<1x4xf32>
    %c2 = arith.constant 2 : index
    %c0_19 = arith.constant 0 : index
    %118 = vector.load %arg2[%c2, %c0_19] : memref<5x4xf32, #tpu.memory_space<vmem>>, vector<1x4xf32>
    tpu.vector_store %arg2[%c2, %c0_19], %117 {strides = array<i32>} : memref<5x4xf32, #tpu.memory_space<vmem>>, vector<1x4xf32>,
    %119 = vector.broadcast %117 : vector<1x4xf32> to vector<4x4xf32>
    %120 = arith.mulf %7, %119 : vector<4x4xf32>
    %cst_20 = arith.constant dense<0.000000e+00> : vector<4xf32>
    %121 = vector.multi_reduction <add>, %120, %cst_20 [1] : vector<4x4xf32> to vector<4xf32>
    %122 = vector.shape_cast %121 : vector<4xf32> to vector<4x1xf32>
    %123 = vector.extract_strided_slice %30 {offsets = [3, 0], sizes = [1, 12], strides = [1, 1]} : vector<5x12xf32> to vector<1x12xf32>
    %124 = vector.broadcast %122 : vector<4x1xf32> to vector<4x12xf32>
    %125 = arith.mulf %124, %2 : vector<4x12xf32>
    %cst_21 = arith.constant dense<0.000000e+00> : vector<12xf32>
    %126 = vector.multi_reduction <add>, %125, %cst_21 [0] : vector<4x12xf32> to vector<12xf32>
    %127 = vector.shape_cast %126 : vector<12xf32> to vector<1x12xf32>
    %128 = vector.extract_strided_slice %123 {offsets = [0, 0], sizes = [1, 8], strides = [1, 1]} : vector<1x12xf32> to vector<1x8xf32>
    %129 = vector.extract_strided_slice %127 {offsets = [0, 0], sizes = [1, 8], strides = [1, 1]} : vector<1x12xf32> to vector<1x8xf32>
    %130 = arith.addf %128, %129 : vector<1x8xf32>
    %131 = arith.negf %130 : vector<1x8xf32>
    %132 = math.exp %131 : vector<1x8xf32>
    %cst_22 = arith.constant 1.000000e+00 : f32
    %133 = vector.broadcast %cst_22 : f32 to vector<1x8xf32>
    %134 = arith.addf %133, %132 : vector<1x8xf32>
    %135 = arith.divf %133, %134 : vector<1x8xf32>
    %136 = vector.extract_strided_slice %135 {offsets = [0, 0], sizes = [1, 4], strides = [1, 1]} : vector<1x8xf32> to vector<1x4xf32>
    %137 = vector.extract_strided_slice %135 {offsets = [0, 4], sizes = [1, 4], strides = [1, 1]} : vector<1x8xf32> to vector<1x4xf32>
    %138 = vector.extract_strided_slice %123 {offsets = [0, 8], sizes = [1, 4], strides = [1, 1]} : vector<1x12xf32> to vector<1x4xf32>
    %139 = vector.extract_strided_slice %127 {offsets = [0, 8], sizes = [1, 4], strides = [1, 1]} : vector<1x12xf32> to vector<1x4xf32>
    %140 = arith.mulf %136, %139 : vector<1x4xf32>
    %141 = arith.addf %138, %140 : vector<1x4xf32>
    %142 = math.tanh %141 : vector<1x4xf32>
    %cst_23 = arith.constant 1.000000e+00 : f32
    %143 = vector.broadcast %cst_23 : f32 to vector<1x4xf32>
    %144 = arith.subf %143, %137 : vector<1x4xf32>
    %145 = arith.mulf %144, %142 : vector<1x4xf32>
    %146 = arith.mulf %137, %117 : vector<1x4xf32>
    %147 = arith.addf %145, %146 : vector<1x4xf32>
    %c3 = arith.constant 3 : index
    %c0_24 = arith.constant 0 : index
    %148 = vector.load %arg2[%c3, %c0_24] : memref<5x4xf32, #tpu.memory_space<vmem>>, vector<1x4xf32>
    tpu.vector_store %arg2[%c3, %c0_24], %147 {strides = array<i32>} : memref<5x4xf32, #tpu.memory_space<vmem>>, vector<1x4xf32>,
    %149 = vector.broadcast %147 : vector<1x4xf32> to vector<4x4xf32>
    %150 = arith.mulf %7, %149 : vector<4x4xf32>
    %cst_25 = arith.constant dense<0.000000e+00> : vector<4xf32>
    %151 = vector.multi_reduction <add>, %150, %cst_25 [1] : vector<4x4xf32> to vector<4xf32>
    %152 = vector.shape_cast %151 : vector<4xf32> to vector<4x1xf32>
    %153 = vector.extract_strided_slice %30 {offsets = [4, 0], sizes = [1, 12], strides = [1, 1]} : vector<5x12xf32> to vector<1x12xf32>
    %154 = vector.broadcast %152 : vector<4x1xf32> to vector<4x12xf32>
    %155 = arith.mulf %154, %2 : vector<4x12xf32>
    %cst_26 = arith.constant dense<0.000000e+00> : vector<12xf32>
    %156 = vector.multi_reduction <add>, %155, %cst_26 [0] : vector<4x12xf32> to vector<12xf32>
    %157 = vector.shape_cast %156 : vector<12xf32> to vector<1x12xf32>
    %158 = vector.extract_strided_slice %153 {offsets = [0, 0], sizes = [1, 8], strides = [1, 1]} : vector<1x12xf32> to vector<1x8xf32>
    %159 = vector.extract_strided_slice %157 {offsets = [0, 0], sizes = [1, 8], strides = [1, 1]} : vector<1x12xf32> to vector<1x8xf32>
    %160 = arith.addf %158, %159 : vector<1x8xf32>
    %161 = arith.negf %160 : vector<1x8xf32>
    %162 = math.exp %161 : vector<1x8xf32>
    %cst_27 = arith.constant 1.000000e+00 : f32
    %163 = vector.broadcast %cst_27 : f32 to vector<1x8xf32>
    %164 = arith.addf %163, %162 : vector<1x8xf32>
    %165 = arith.divf %163, %164 : vector<1x8xf32>
    %166 = vector.extract_strided_slice %165 {offsets = [0, 0], sizes = [1, 4], strides = [1, 1]} : vector<1x8xf32> to vector<1x4xf32>
    %167 = vector.extract_strided_slice %165 {offsets = [0, 4], sizes = [1, 4], strides = [1, 1]} : vector<1x8xf32> to vector<1x4xf32>
    %168 = vector.extract_strided_slice %153 {offsets = [0, 8], sizes = [1, 4], strides = [1, 1]} : vector<1x12xf32> to vector<1x4xf32>
    %169 = vector.extract_strided_slice %157 {offsets = [0, 8], sizes = [1, 4], strides = [1, 1]} : vector<1x12xf32> to vector<1x4xf32>
    %170 = arith.mulf %166, %169 : vector<1x4xf32>
    %171 = arith.addf %168, %170 : vector<1x4xf32>
    %172 = math.tanh %171 : vector<1x4xf32>
    %cst_28 = arith.constant 1.000000e+00 : f32
    %173 = vector.broadcast %cst_28 : f32 to vector<1x4xf32>
    %174 = arith.subf %173, %167 : vector<1x4xf32>
    %175 = arith.mulf %174, %172 : vector<1x4xf32>
    %176 = arith.mulf %167, %147 : vector<1x4xf32>
    %177 = arith.addf %175, %176 : vector<1x4xf32>
    %c4_29 = arith.constant 4 : index
    %c0_30 = arith.constant 0 : index
    %178 = vector.load %arg2[%c4_29, %c0_30] : memref<5x4xf32, #tpu.memory_space<vmem>>, vector<1x4xf32>
    tpu.vector_store %arg2[%c4_29, %c0_30], %177 {strides = array<i32>} : memref<5x4xf32, #tpu.memory_space<vmem>>, vector<1x4xf32>,
    return
  }
}

</mosaic_0001>

<bundles_post_ra>
// kernel: gru_forward.1
= control target key start
LH: loop header
LB: loop body
LE: loop exit
PB: predicated region body
PF: predicated region fallthrough
CT: control target
= control target key end

     0   :  { %v372_v0 = vmov 0   ;;  %v373_v2 = vmov 2   ;;  %vm62_vm0 = vcmask 93184   ;;  %v374_v7 = vmov 1   ;;  %s378_s15 = smov 124   ;;  %s511_s0 = inlined_call_operand.vmem [shape: f32[5,4], index: 0, kind: input, shape index: {}]   ;;  %s512_s1 = inlined_call_operand.vmem [shape: f32[8,12], index: 1, kind: input, shape index: {}]   ;;  %s513_s2 = inlined_call_operand.vmem [shape: f32[5,4], index: 2, kind: output, shape index: {}]  }
   0x1   :  { %337 = vset.pattern.permute.xlu0 %v372_v0  ;;  %v11_v1 = vld [vmem:[%s511_s0] sm:$0x1f]  ;;  %339 = vset.pattern.permute.xlu1 %v373_v2  ;;  %v375_v8 = vmov 3   ;;  %s376_s0 = smov 120   ;;  %v14_v14 = vlaneseq  ;;  %v379_v53 = vmov 0.0   ;;  %vm111_vm2 = vcmask 27648  }
   0x2   :  { %v401_v3 = vld [vmem:[%s512_s1 + $0x4] sm:$0xf]  ;;  %23 = vperm.xlu0 %337, %v11_v1   ;;  %42 = vperm.xlu1 %339, %v11_v1   ;;  %v12_v18 = vld [vmem:[%s512_s1] sm:$0xf]  ;;  %s377_s1 = smov 8   ;;  %vm100_vm3 = vcmask 24576  }
   0x3   :  { %v61_v4 = vmul.f32 0.0, %v401_v3  ;;  %v406_v15 = vshrl.u32 %v14_v14, 7  ;;  %v17_v52 = vand.u32 127, %v14_v14  ;;  %vm155_vm4 = vcmask 25601  }
   0x4   :  { %vm209_vm5 = vcmask 26626   ;;  %vm263_vm6 = vcmask 27651   ;;  %vm317_vm7 = vcmask 28676  }
   0x5   :  { %v63_v5 = vsel %vm62_vm0, %v61_v4, 0.0  ;;  %v28_v16 = vsub.s32 0, %v406_v15  ;;  %v37_v17 = vsub.s32 1, %v406_v15  ;;  %v47_v20 = vsub.s32 2, %v406_v15 }
   0x6   :  { %v64_v6 = vrot.slane %v63_v5, 4  ;;  %338 = vset.pattern.permute.xlu0 %v374_v7  ;;  %340 = vset.pattern.permute.xlu1 %v375_v8  ;;  %v57_v22 = vsub.s32 3, %v406_v15  ;;  %vm18_vm1 = vcmp.eq.s32.totalorder %v406_v15, %v17_v52 }
   0x7   :  { %32 = vperm.xlu0 %338, %v11_v1   ;;  %52 = vperm.xlu1 %340, %v11_v1   ;;  %v29_v23 = vrot.slane %v12_v18, %v28_v16  ;;  %v38_v24 = vrot.slane %v12_v18, %v37_v17  ;;  %v48_v25 = vrot.slane %v12_v18, %v47_v20  ;;  %v432_v54 = vsel %vm18_vm1, 1.0, %v379_v53 }
   0x8   :  { %v65_v9 = vadd.f32 %v64_v6, %v63_v5  ;;  %v58_v26 = vrot.slane %v12_v18, %v57_v22 }
   0xa   :  { %v66_v10 = vrot.slane %v65_v9, 2 }
   0xb   :  { %341 = vset.pattern.permute.xlu0 %v375_v8 }
   0xc   :  { %v67_v11 = vadd.f32 %v66_v10, %v65_v9 }
   0xe   :  { %v68_v12 = vrot.slane %v67_v11, 1 }
  0x10   :  { %v69_v13 = vadd.f32 %v68_v12, %v67_v11 }
  0x12   :  { %78 = vrot.lane.b32.xlu1 %v69_v13, %s376_s0 }
  0x81   :  { %v24_v19 = vpop.permute.xlu0 %23  ;;  %v43_v21 = vpop.permute.xlu1 %42 }
  0x82   :  { %v30_v29 = vmul.f32 %v29_v23, %v24_v19  ;;  %v49_v31 = vmul.f32 %v48_v25, %v43_v21 }
  0x86   :  { %v33_v27 = vpop.permute.xlu0 %32  ;;  %v53_v28 = vpop.permute.xlu1 %52 }
  0x87   :  { %v39_v30 = vmul.f32 %v38_v24, %v33_v27  ;;  %v59_v33 = vmul.f32 %v58_v26, %v53_v28 }
  0x89   :  { %v40_v32 = vadd.f32 %v39_v30, %v30_v29 }
  0x8a   :  { %v79_v40 = vpop.permute.xlu1 %78 }
  0x8b   :  { %v50_v34 = vadd.f32 %v49_v31, %v40_v32 }
  0x8d   :  { %v421_v35 = vadd.f32 %v59_v33, %v50_v34 }
  0x8f   :  { %v70_v36 = vadd.f32 %v69_v13, %v421_v35 }
  0x91   :  { %v324_v37 = vmul.f32 -1.442695, %v70_v36 }
  0x93   :  { %342 = vpow2.f32 %v324_v37 }
  0x9d   :  { %v343_v38 = vpop.eup %342 }
  0x9e   :  { %v74_v39 = vadd.f32 1.0, %v343_v38 }
  0xa0   :  { %344 = vrcp.f32 %v74_v39 }
  0xaa   :  { %v345_v41 = vpop.eup %344 }
  0xab   :  { %v81_v42 = vmul.f32 %v345_v41, %v79_v40  ;;  %v88_v46 = vsub.f32 1.0, %v345_v41  ;;  %v94_v48 = vmul.f32 0.0, %v345_v41 }
  0xad   :  { %83 = vrot.lane.b32.xlu0 %v81_v42, %s377_s1 }
 0x11f   :  { %v84_v43 = vpop.permute.xlu0 %83 }
 0x120   :  { %v86_v44 = vadd.f32 %v84_v43, %v421_v35 }
 0x122   :  { %346 = vtanh.f32 %v86_v44 }
 0x12c   :  { %v347_v45 = vpop.eup %346 }
 0x12d   :  { %90 = vrot.lane.b32.xlu1 %v347_v45, %s378_s15 }
 0x19f   :  { %v91_v47 = vpop.permute.xlu1 %90 }
 0x1a0   :  { %v93_v49 = vmul.f32 %v91_v47, %v88_v46 }
 0x1a2   :  { %v427_v50 = vadd.f32 %v94_v48, %v93_v49 }
 0x1a4   :  { %v105_v51 = vrot.slane %v427_v50, %v28_v16  ;;  %v147_v16 = vrot.slane %v427_v50, 7 }
 0x1a6   :  { %107 = vrot.lane.b32.xlu0 %v105_v51, %s378_s15 }
 0x218   :  { %v108_v55 = vpop.permute.xlu0 %107 }
 0x219   :  { %v110_v56 = vmul.f32 %v432_v54, %v108_v55 }
 0x21b   :  { %v112_v57 = vsel %vm111_vm2, %v110_v56, 0.0 }
 0x21c   :  { %113 = vadd.xlane.f32.xlu1 %v112_v57 }
 0x2a9   :  { %v114_v58 = vpop.xlane.xlu1 %113 }
 0x2aa   :  { %v115_v59 = vmul.f32 %v114_v58, %v401_v3 }
 0x2ac   :  { %v116_v60 = vsel %vm62_vm0, %v115_v59, 0.0 }
 0x2ad   :  { %v117_v61 = vrot.slane %v116_v60, 4 }
 0x2af   :  { %v118_v62 = vadd.f32 %v117_v61, %v116_v60 }
 0x2b1   :  { %v119_v63 = vrot.slane %v118_v62, 2 }
 0x2b3   :  { %v120_v0 = vadd.f32 %v119_v63, %v118_v62 }
 0x2b5   :  { %v121_v1 = vrot.slane %v120_v0, 1 }
 0x2b7   :  { %v122_v2 = vadd.f32 %v121_v1, %v120_v0 }
 0x2b9   :  { %131 = vrot.lane.b32.xlu0 %v122_v2, %s376_s0  ;;  %v123_v4 = vadd.f32 %v122_v2, %v421_v35 }
 0x2bb   :  { %v325_v5 = vmul.f32 -1.442695, %v123_v4 }
 0x2bd   :  { %348 = vpow2.f32 %v325_v5 }
 0x2c7   :  { %v349_v6 = vpop.eup %348 }
 0x2c8   :  { %v127_v7 = vadd.f32 1.0, %v349_v6 }
 0x2ca   :  { %350 = vrcp.f32 %v127_v7 }
 0x2d4   :  { %v351_v8 = vpop.eup %350 }
 0x2d5   :  { %v141_v14 = vsub.f32 1.0, %v351_v8  ;;  %v149_v19 = vmul.f32 %v351_v8, %v147_v16 }
 0x32b   :  { %v132_v9 = vpop.permute.xlu0 %131 }
 0x32c   :  { %v134_v10 = vmul.f32 %v351_v8, %v132_v9 }
 0x32e   :  { %136 = vrot.lane.b32.xlu0 %v134_v10, %s377_s1 }
 0x3a0   :  { %v137_v11 = vpop.permute.xlu0 %136 }
 0x3a1   :  { %v139_v12 = vadd.f32 %v137_v11, %v421_v35 }
 0x3a3   :  { %352 = vtanh.f32 %v139_v12 }
 0x3ad   :  { %v353_v13 = vpop.eup %352 }
 0x3ae   :  { %143 = vrot.lane.b32.xlu0 %v353_v13, %s378_s15 }
 0x420   :  { %v144_v18 = vpop.permute.xlu0 %143 }
 0x421   :  { %v146_v21 = vmul.f32 %v144_v18, %v141_v14 }
 0x423   :  { %v444_v23 = vadd.f32 %v149_v19, %v146_v21 }
 0x425   :  { %v160_v24 = vrot.slane %v444_v23, %v37_v17  ;;  %v201_v48 = vrot.slane %v444_v23, 7 }
 0x427   :  { %162 = vrot.lane.b32.xlu0 %v160_v24, %s378_s15 }
 0x499   :  { %v163_v25 = vpop.permute.xlu0 %162 }
 0x49a   :  { %v165_v26 = vmul.f32 %v432_v54, %v163_v25 }
 0x49c   :  { %v166_v27 = vsel %vm111_vm2, %v165_v26, 0.0 }
 0x49d   :  { %167 = vadd.xlane.f32.xlu0 %v166_v27 }
 0x52a   :  { %v168_v28 = vpop.xlane.xlu0 %167 }
 0x52b   :  { %v169_v29 = vmul.f32 %v168_v28, %v401_v3 }
 0x52d   :  { %v170_v30 = vsel %vm62_vm0, %v169_v29, 0.0 }
 0x52e   :  { %v171_v31 = vrot.slane %v170_v30, 4 }
 0x530   :  { %v172_v32 = vadd.f32 %v171_v31, %v170_v30 }
 0x532   :  { %v173_v33 = vrot.slane %v172_v32, 2 }
 0x534   :  { %v174_v34 = vadd.f32 %v173_v33, %v172_v32 }
 0x536   :  { %v175_v36 = vrot.slane %v174_v34, 1 }
 0x538   :  { %v176_v37 = vadd.f32 %v175_v36, %v174_v34 }
 0x53a   :  { %185 = vrot.lane.b32.xlu1 %v176_v37, %s376_s0  ;;  %v177_v17 = vadd.f32 %v176_v37, %v421_v35 }
 0x53c   :  { %v326_v38 = vmul.f32 -1.442695, %v177_v17 }
 0x53e   :  { %354 = vpow2.f32 %v326_v38 }
 0x548   :  { %v355_v39 = vpop.eup %354 }
 0x549   :  { %v181_v40 = vadd.f32 1.0, %v355_v39 }
 0x54b   :  { %356 = vrcp.f32 %v181_v40 }
 0x555   :  { %v357_v41 = vpop.eup %356 }
 0x556   :  { %v195_v47 = vsub.f32 1.0, %v357_v41  ;;  %v203_v51 = vmul.f32 %v357_v41, %v201_v48 }
 0x5ac   :  { %v186_v42 = vpop.permute.xlu1 %185 }
 0x5ad   :  { %v188_v43 = vmul.f32 %v357_v41, %v186_v42 }
 0x5af   :  { %190 = vrot.lane.b32.xlu0 %v188_v43, %s377_s1 }
 0x621   :  { %v191_v44 = vpop.permute.xlu0 %190 }
 0x622   :  { %v193_v45 = vadd.f32 %v191_v44, %v421_v35 }
 0x624   :  { %358 = vtanh.f32 %v193_v45 }
 0x62e   :  { %v359_v46 = vpop.eup %358 }
 0x62f   :  { %197 = vrot.lane.b32.xlu1 %v359_v46, %s378_s15 }
 0x6a1   :  { %v198_v49 = vpop.permute.xlu1 %197 }
 0x6a2   :  { %v200_v52 = vmul.f32 %v198_v49, %v195_v47 }
 0x6a4   :  { %v460_v53 = vadd.f32 %v203_v51, %v200_v52 }
 0x6a6   :  { %v214_v55 = vrot.slane %v460_v53, %v47_v20  ;;  %v255_v16 = vrot.slane %v460_v53, 7 }
 0x6a8   :  { %216 = vrot.lane.b32.xlu1 %v214_v55, %s378_s15 }
 0x71a   :  { %v217_v56 = vpop.permute.xlu1 %216 }
 0x71b   :  { %v219_v57 = vmul.f32 %v432_v54, %v217_v56 }
 0x71d   :  { %v220_v58 = vsel %vm111_vm2, %v219_v57, 0.0 }
 0x71e   :  { %221 = vadd.xlane.f32.xlu1 %v220_v58 }
 0x7ab   :  { %v222_v59 = vpop.xlane.xlu1 %221 }
 0x7ac   :  { %v223_v60 = vmul.f32 %v222_v59, %v401_v3 }
 0x7ae   :  { %v224_v61 = vsel %vm62_vm0, %v223_v60, 0.0 }
 0x7af   :  { %v225_v62 = vrot.slane %v224_v61, 4 }
 0x7b1   :  { %v226_v63 = vadd.f32 %v225_v62, %v224_v61 }
 0x7b3   :  { %v227_v0 = vrot.slane %v226_v63, 2 }
 0x7b5   :  { %v228_v1 = vadd.f32 %v227_v0, %v226_v63 }
 0x7b7   :  { %v229_v2 = vrot.slane %v228_v1, 1 }
 0x7b9   :  { %v230_v4 = vadd.f32 %v229_v2, %v228_v1 }
 0x7bb   :  { %239 = vrot.lane.b32.xlu0 %v230_v4, %s376_s0  ;;  %v231_v20 = vadd.f32 %v230_v4, %v421_v35 }
 0x7bd   :  { %v327_v5 = vmul.f32 -1.442695, %v231_v20 }
 0x7bf   :  { %360 = vpow2.f32 %v327_v5 }
 0x7c9   :  { %v361_v6 = vpop.eup %360 }
 0x7ca   :  { %v235_v7 = vadd.f32 1.0, %v361_v6 }
 0x7cc   :  { %362 = vrcp.f32 %v235_v7 }
 0x7d6   :  { %v363_v8 = vpop.eup %362 }
 0x7d7   :  { %v249_v14 = vsub.f32 1.0, %v363_v8  ;;  %v257_v19 = vmul.f32 %v363_v8, %v255_v16 }
 0x82d   :  { %v240_v9 = vpop.permute.xlu0 %239 }
 0x82e   :  { %v242_v10 = vmul.f32 %v363_v8, %v240_v9 }
 0x830   :  { %244 = vrot.lane.b32.xlu0 %v242_v10, %s377_s1 }
 0x8a2   :  { %v245_v11 = vpop.permute.xlu0 %244 }
 0x8a3   :  { %v247_v12 = vadd.f32 %v245_v11, %v421_v35 }
 0x8a5   :  { %364 = vtanh.f32 %v247_v12 }
 0x8af   :  { %v365_v13 = vpop.eup %364 }
 0x8b0   :  { %251 = vrot.lane.b32.xlu0 %v365_v13, %s378_s15 }
 0x922   :  { %v252_v18 = vpop.permute.xlu0 %251 }
 0x923   :  { %v254_v21 = vmul.f32 %v252_v18, %v249_v14 }
 0x925   :  { %v258_v24 = vadd.f32 %v257_v19, %v254_v21 }
 0x927   :  { %v268_v25 = vrot.slane %v258_v24, %v57_v22  ;;  %v309_v45 = vrot.slane %v258_v24, 7 }
 0x929   :  { %270 = vrot.lane.b32.xlu0 %v268_v25, %s378_s15 }
 0x99b   :  { %v271_v26 = vpop.permute.xlu0 %270 }
 0x99c   :  { %v273_v27 = vmul.f32 %v432_v54, %v271_v26 }
 0x99e   :  { %v274_v28 = vsel %vm111_vm2, %v273_v27, 0.0 }
 0x99f   :  { %275 = vadd.xlane.f32.xlu0 %v274_v28 }
 0x9b5   :  { %97 = vrot.lane.b32.xlu0 %v427_v50, %s378_s15 }
 0xa2c   :  { %v276_v29 = vpop.xlane.xlu0 %275 }
 0xa2d   :  { %v277_v30 = vmul.f32 %v276_v29, %v401_v3 }
 0xa2f   :  { %v278_v31 = vsel %vm62_vm0, %v277_v30, 0.0 }
 0xa30   :  { %v279_v32 = vrot.slane %v278_v31, 4  ;;  %v98_v15 = vpop.permute.xlu0 %97 }
 0xa31   :  { %101 = vst.msk [vmem:[%s513_s2] sm:$0x1] %vm100_vm3, %v98_v15 }
 0xa32   :  { %v280_v22 = vadd.f32 %v279_v32, %v278_v31 }
 0xa34   :  { %v281_v54 = vrot.slane %v280_v22, 2 }
 0xa36   :  { %v282_v33 = vadd.f32 %v281_v54, %v280_v22 }
 0xa38   :  { %v283_v34 = vrot.slane %v282_v33, 1 }
 0xa3a   :  { %v284_v36 = vadd.f32 %v283_v34, %v282_v33 }
 0xa3c   :  { %293 = vrot.lane.b32.xlu1 %v284_v36, %s376_s0  ;;  %v285_v50 = vadd.f32 %v284_v36, %v421_v35 }
 0xa3e   :  { %v328_v37 = vmul.f32 -1.442695, %v285_v50 }
 0xa40   :  { %366 = vpow2.f32 %v328_v37 }
 0xa4a   :  { %v367_v3 = vpop.eup %366 }
 0xa4b   :  { %v289_v17 = vadd.f32 1.0, %v367_v3 }
 0xa4d   :  { %368 = vrcp.f32 %v289_v17 }
 0xa57   :  { %v369_v38 = vpop.eup %368 }
 0xa58   :  { %v303_v44 = vsub.f32 1.0, %v369_v38  ;;  %v311_v47 = vmul.f32 %v369_v38, %v309_v45 }
 0xaae   :  { %v294_v39 = vpop.permute.xlu1 %293 }
 0xaaf   :  { %v296_v40 = vmul.f32 %v369_v38, %v294_v39 }
 0xab1   :  { %298 = vrot.lane.b32.xlu1 %v296_v40, %s377_s1 }
 0xb23   :  { %v299_v41 = vpop.permute.xlu1 %298 }
 0xb24   :  { %v301_v42 = vadd.f32 %v299_v41, %v421_v35 }
 0xb26   :  { %370 = vtanh.f32 %v301_v42 }
 0xb30   :  { %v371_v43 = vpop.eup %370 }
 0xb31   :  { %305 = vrot.lane.b32.xlu1 %v371_v43, %s378_s15 }
 0xb35   :  { %152 = vrot.lane.b32.xlu1 %v444_v23, %s378_s15 }
 0xb39   :  { %206 = vrot.lane.b32.xlu1 %v460_v53, %s378_s15 }
 0xb3d   :  { %260 = vrot.lane.b32.xlu1 %v258_v24, %s378_s15 }
 0xba3   :  { %v306_v46 = vpop.permute.xlu1 %305 }
 0xba4   :  { %v308_v48 = vmul.f32 %v306_v46, %v303_v44 }
 0xba6   :  { %v312_v49 = vadd.f32 %v311_v47, %v308_v48 }
 0xba7   :  { %v153_v35 = vpop.permute.xlu1 %152 }
 0xba8   :  { %156 = vst.msk [vmem:[%s513_s2] sm:$0x2] %vm155_vm4, %v153_v35  ;;  %314 = vrot.lane.b32.xlu1 %v312_v49, %s378_s15 }
 0xbab   :  { %v207_v23 = vpop.permute.xlu1 %206 }
 0xbac   :  { %210 = vst.msk [vmem:[%s513_s2] sm:$0x4] %vm209_vm5, %v207_v23 }
 0xbaf   :  { %v261_v51 = vpop.permute.xlu1 %260 }
 0xbb0   :  { %264 = vst.msk [vmem:[%s513_s2] sm:$0x8] %vm263_vm6, %v261_v51 }
 0xc1a   :  { %v315_v52 = vpop.permute.xlu1 %314 }
 0xc1b   :  { %318 = vst.msk [vmem:[%s513_s2] sm:$0x10] %vm317_vm7, %v315_v52 }

</bundles_post_ra>
